<compile_context>
chip_gen: v7x
topology: tpu7x:2x2x1
jax: 0.10.0
libtpu: 0.0.40
codegen_flags: <defaults>
</compile_context>

<pallas_src>
import jax
import jax.numpy as jnp
from jax.experimental import pallas as pl
from jax.experimental.pallas import tpu as pltpu


_TARGET_BLOCK_BYTES = 2 << 20        # ~2 MiB/block (85%+ of HBM roofline plateau)
_MIN_MULTI_BLOCK_BYTES = 512 << 10   # above this, force >=2 grid steps (megacore)
_LANE = 128


def _normalize_kernel(mean_ref, inv_std_ref, x_ref, o_ref):
    # mean_ref / inv_std_ref: (block_rows, 1) per-row constants, broadcast over lanes.
    # One VALU sub + one VALU mul per element — no per-element divide.
    o_ref[...] = (x_ref[...] - mean_ref[...]) * inv_std_ref[...]


def _pick_block(rows, cols, itemsize, target_bytes=_TARGET_BLOCK_BYTES):
    """Fixed (sublane, lane)-aligned block around the ~2 MiB plateau.

    Full-extent blocks are used only when a dim fits the budget (always legal);
    otherwise an aligned block with a pl.cdiv grid and masked boundary tiles,
    so no exact-divisibility requirement on the input shape."""
    sub = max(8, 32 // itemsize)  # dtype-aware sublane unit: f32->8, bf16->16, i8->32

    # Lane (last) dim first: widen it, but leave room for at least `sub` rows.
    max_cols = max(_LANE, (target_bytes // (sub * itemsize)) // _LANE * _LANE)
    block_cols = cols if cols <= max_cols else max_cols

    # Sublane dim fills the remaining budget.
    max_rows = max(sub, (target_bytes // (block_cols * itemsize)) // sub * sub)
    block_rows = rows if rows <= max_rows else max_rows

    # Megacore: ensure medium/large arrays produce >=2 parallel grid steps so
    # both v7x TensorCores stream (and the DMA pipeline has steps to overlap).
    if (pl.cdiv(rows, block_rows) * pl.cdiv(cols, block_cols) == 1
            and rows * cols * itemsize >= _MIN_MULTI_BLOCK_BYTES):
        if cols >= 2 * _LANE:
            block_cols = pl.cdiv(cols, 2 * _LANE) * _LANE
        elif rows >= 2 * sub:
            block_rows = pl.cdiv(rows, 2 * sub) * sub

    return block_rows, block_cols


def normalize(x, mean, std):
    """x: (N, C, H, W); mean, std: (C,).  Returns (x - mean[c]) / std[c]."""
    N, C, H, W = x.shape
    R, L = N * C, H * W
    dtype = x.dtype
    itemsize = jnp.dtype(dtype).itemsize

    # Free, contiguous reshape to a lane-dense 2D view.
    x2 = x.reshape(R, L)

    # Per-row constants (channel-major within each image). The reciprocal is
    # computed once, on C elements, in f32 — the kernel never divides.
    mean_f32 = mean.astype(jnp.float32)
    inv_std_f32 = 1.0 / std.astype(jnp.float32)
    mean_rows = jnp.tile(mean_f32, N).reshape(R, 1).astype(dtype)
    inv_std_rows = jnp.tile(inv_std_f32, N).reshape(R, 1).astype(dtype)

    block_rows, block_cols = _pick_block(R, L, itemsize)
    # Lane axis (j) innermost; mean/std index_maps ignore j (no re-DMA per j).
    grid = (pl.cdiv(R, block_rows), pl.cdiv(L, block_cols))

    out2 = pl.pallas_call(
        _normalize_kernel,
        out_shape=jax.ShapeDtypeStruct((R, L), dtype),
        grid=grid,
        in_specs=[
            pl.BlockSpec((block_rows, 1), lambda i, j: (i, 0)),           # mean per row
            pl.BlockSpec((block_rows, 1), lambda i, j: (i, 0)),           # 1/std per row
            pl.BlockSpec((block_rows, block_cols), lambda i, j: (i, j)),  # x tile
        ],
        out_specs=pl.BlockSpec((block_rows, block_cols), lambda i, j: (i, j)),
        compiler_params=pltpu.CompilerParams(
            dimension_semantics=("parallel", "parallel"),
        ),
    )(mean_rows, inv_std_rows, x2)

    return out2.reshape(N, C, H, W)


if __name__ == "__main__":
    key = jax.random.PRNGKey(0)
    # Module reshapes mean/std to (1, 3, 1, 1) -> C must be 3.
    N, C, H, W = 2, 3, 16, 16
    x = jax.random.normal(key, (N, C, H, W), dtype=jnp.float32)

    # Deterministic buffer values (ImageNet-style constants).
    mean = jnp.array([0.485, 0.456, 0.406], dtype=jnp.float32)
    std = jnp.array([0.229, 0.224, 0.225], dtype=jnp.float32)

    out = normalize(x, mean, std)
    out = jax.block_until_ready(out)

    # Reference check in plain JAX (same semantics as the PyTorch module).
    ref = (x - mean.reshape(1, 3, 1, 1)) / std.reshape(1, 3, 1, 1)
    assert out.shape == ref.shape and out.dtype == ref.dtype
    assert jnp.allclose(out, ref, rtol=1e-6, atol=1e-6)

    print("KERNEL_OK")
</pallas_src>

<mosaic_0001>
module attributes {stable_mosaic.version = 11 : i64} {
  func.func @_normalize_kernel(%arg0: i32, %arg1: i32, %arg2: memref<6x1xf32, #tpu.memory_space<vmem>>, %arg3: memref<6x1xf32, #tpu.memory_space<vmem>>, %arg4: memref<6x256xf32, #tpu.memory_space<vmem>>, %arg5: memref<6x256xf32, #tpu.memory_space<vmem>>) attributes {dimension_semantics = [#tpu.dimension_semantics<parallel>, #tpu.dimension_semantics<parallel>], iteration_bounds = array<i64: 1, 1>, scalar_prefetch = 0 : i64, scratch_operands = 0 : i64, tpu.core_type = #tpu.core_type<tc>, window_params = [{transform_indices = @transform_0, window_bounds = array<i64: 6, 1>}, {transform_indices = @transform_1, window_bounds = array<i64: 6, 1>}, {transform_indices = @transform_2, window_bounds = array<i64: 6, 256>}, {transform_indices = @transform_3, window_bounds = array<i64: 6, 256>}]} {
    %c0 = arith.constant 0 : index
    %c0_0 = arith.constant 0 : index
    %0 = vector.load %arg4[%c0, %c0_0] : memref<6x256xf32, #tpu.memory_space<vmem>>, vector<6x256xf32>
    %c0_1 = arith.constant 0 : index
    %c0_2 = arith.constant 0 : index
    %1 = vector.load %arg2[%c0_1, %c0_2] : memref<6x1xf32, #tpu.memory_space<vmem>>, vector<6x1xf32>
    %2 = vector.broadcast %1 : vector<6x1xf32> to vector<6x256xf32>
    %3 = arith.subf %0, %2 : vector<6x256xf32>
    %c0_3 = arith.constant 0 : index
    %c0_4 = arith.constant 0 : index
    %4 = vector.load %arg3[%c0_3, %c0_4] : memref<6x1xf32, #tpu.memory_space<vmem>>, vector<6x1xf32>
    %5 = vector.broadcast %4 : vector<6x1xf32> to vector<6x256xf32>
    %6 = arith.mulf %3, %5 : vector<6x256xf32>
    %c0_5 = arith.constant 0 : index
    %c0_6 = arith.constant 0 : index
    %7 = vector.load %arg5[%c0_5, %c0_6] : memref<6x256xf32, #tpu.memory_space<vmem>>, vector<6x256xf32>
    tpu.vector_store %arg5[%c0_5, %c0_6], %6 {strides = array<i32>} : memref<6x256xf32, #tpu.memory_space<vmem>>, vector<6x256xf32>,
    return
  }
  func.func @transform_0(%arg0: i32, %arg1: i32) -> (i32, i32) {
    %c0_i32 = arith.constant 0 : i32
    %c0_i32_0 = arith.constant 0 : i32
    return %arg0, %c0_i32 : i32, i32
  }
  func.func @transform_1(%arg0: i32, %arg1: i32) -> (i32, i32) {
    %c0_i32 = arith.constant 0 : i32
    %c0_i32_0 = arith.constant 0 : i32
    return %arg0, %c0_i32 : i32, i32
  }
  func.func @transform_2(%arg0: i32, %arg1: i32) -> (i32, i32) {
    %c0_i32 = arith.constant 0 : i32
    return %arg0, %arg1 : i32, i32
  }
  func.func @transform_3(%arg0: i32, %arg1: i32) -> (i32, i32) {
    %c0_i32 = arith.constant 0 : i32
    return %arg0, %arg1 : i32, i32
  }
}

</mosaic_0001>

<bundles_post_ra>
// kernel: tpu_custom_call.1
= control target key start
LH: loop header
LB: loop body
LE: loop exit
PB: predicated region body
PF: predicated region fallthrough
CT: control target
= control target key end

     0   :  { %v76_v1 = vmov 0   ;;  %s122_s0 = inlined_call_operand.vmem [shape: f32[6,1], index: 0, kind: input, shape index: {}]   ;;  %s123_s1 = inlined_call_operand.vmem [shape: f32[6,1], index: 1, kind: input, shape index: {}]   ;;  %s124_s2 = inlined_call_operand.vmem [shape: f32[6,256], index: 2, kind: input, shape index: {}]   ;;  %s125_s3 = inlined_call_operand.hbm [shape: f32[6,256], index: 3, kind: output, shape index: {}]  }
   0x1   :  { %v17_v0 = vld [vmem:[%s122_s0] sm:$0x3f]  ;;  %51 = vset.pattern.permute.xlu0 %v76_v1 }
   0x2   :  { %8 = vsyncpa [#allocation3], 0  ;;  %20 = vperm.xlu0 %51, %v17_v0   ;;  %v25_v2 = vld [vmem:[%s123_s1] sm:$0x3f]  ;;  %v16_v5 = vld [vmem:[%s124_s2 + $0x8] sm:$0x3f] }
   0x3   :  { %v15_v4 = vld [vmem:[%s124_s2] sm:$0x3f]  ;;  %s77_s20 = smov [#allocation2]  }
   0x4   :  { %s41_s0 = sshll.u32 %s77_s20, 4  ;;  %s42_s0 = int_to_ptr.vmem [resolvable:$true] %s41_s0 }
   0x5   :  { %s52_s1 = scalar_lea.vmem %s42_s0, 256  ;;  %p57_p1 = scmp.lt.s32.totalorder %s42_s0, %s42_s0 }
   0x6   :  { %28 = vperm.xlu0 %51, %v25_v2   ;;  %p53_p0 = scmp.ne.s32.totalorder %s42_s0, %s52_s1  ;;  %p58_p2 = scmp.lt.s32.totalorder %s52_s1, %s52_s1 }
   0x8   :  { %p59_p3 = por %p58_p2, %p57_p1 }
   0xa   :  { %p60_p4 = pnand %p59_p3, %p53_p0 }
  0x81   :  { %v21_v3 = vpop.permute.xlu0 %20 }
  0x82   :  { %v23_v6 = vsub.f32 %v15_v4, %v21_v3  ;;  %v24_v7 = vsub.f32 %v16_v5, %v21_v3 }
  0x85   :  { %v29_v8 = vpop.permute.xlu0 %28 }
  0x86   :  { %v31_v9 = vmul.f32 %v29_v8, %v23_v6  ;;  %v32_v10 = vmul.f32 %v29_v8, %v24_v7 }
  0x88   :  { %33 = vst [vmem:[#allocation2] sm:$0x3f] %v31_v9  ;;  %34 = vst [vmem:[#allocation2 + $0x8] sm:$0x3f] %v32_v10 }
  0x89   :  { %63 = shalt.err (!%p60_p4)
}
  0x8a   :  { %s64_s2 = scalar_lea.hbm %s125_s3, 256 }
  0x8b   :  { %p65_p5 = scmp.ne.s32.totalorder %s125_s3, %s64_s2  ;;  %p68_p6 = scmp.lt.u32.totalorder %s64_s2, %s125_s3 }
  0x8d   :  { %p70_p7 = pnand %p68_p6, %p65_p5 }
  0x8f   :  { %73 = shalt.err (!%p70_p7)
}
  0x90   :  { %44 = dma.vmem_to_hbm [thread:$0]  %s42_s0, 256, %s125_s3, [#allocation3]  }
  0x91   :  { %74 = dma.done.wait [#allocation3], 256  }
  0x92   :  { %75 = vsyncadd [#allocation3], 4294967040 }
  0x93   :  { %48 = vsyncpa [#allocation3], 1 }

</bundles_post_ra>
